<compile_context>
chip_gen: v5e
topology: v5e:2x2
jax: 0.10.0
libtpu: 0.0.40
codegen_flags: <defaults>
</compile_context>

<pallas_src>
import functools

import jax
import jax.numpy as jnp
from jax import lax
from jax.experimental import pallas as pl
from jax.experimental.pallas import tpu as pltpu


def _attention_kernel(x_ref, wqkv_ref, bqkv_ref, wo_ref, bo_ref, o_ref, *,
                      n_tokens, num_heads):
    # Per-grid-step shapes:
    #   x_ref   : (batch_block * N, C)   dense row slab for this step
    #   wqkv_ref: (C, 3C)   fused qkv weight, q-columns pre-scaled   (resident)
    #   bqkv_ref: (1, 3C)   fused qkv bias,  q-part   pre-scaled     (resident)
    #   wo_ref  : (C, C)    proj weight transposed (rows = head-major (h, d)) (resident)
    #   bo_ref  : (1, C)
    #   o_ref   : (batch_block * N, C)
    f32 = jnp.float32
    rows, C = x_ref.shape
    N = n_tokens
    H = num_heads
    hd = C // H
    bb = rows // N                     # samples in this block (static)

    x = x_ref[...].astype(f32)                                              # (rows, C)

    # Single fused QKV projection for all rows and all heads (1 MXU matmul).
    qkv = jnp.dot(x, wqkv_ref[...].astype(f32),
                  preferred_element_type=f32) + bqkv_ref[...].astype(f32)   # (rows, 3C)

    out_rows = []
    for b in range(bb):                # static, fully unrolled (bb is small)
        r0 = b * N
        head_outs = []
        for h in range(H):             # static, fully unrolled
            c0 = h * hd
            q = qkv[r0:r0 + N, c0:c0 + hd]                   # (N, hd)  scale already folded
            k = qkv[r0:r0 + N, C + c0:C + c0 + hd]           # (N, hd)
            v = qkv[r0:r0 + N, 2 * C + c0:2 * C + c0 + hd]   # (N, hd)

            # scores = q @ k^T  (scale folded into q) -> MXU, f32 accumulation
            s = lax.dot_general(q, k, (((1,), (1,)), ((), ())),
                                preferred_element_type=f32)   # (N, N)
            s = s - jnp.max(s, axis=-1, keepdims=True)        # XLU lane reduce
            p = jnp.exp(s)                                    # EUP
            # reciprocal on the EUP slot instead of a VPU divide
            p = p * pl.reciprocal(jnp.sum(p, axis=-1, keepdims=True), approx=True)

            head_outs.append(jnp.dot(p, v, preferred_element_type=f32))     # (N, hd)

        # Lane-concatenate heads head-major -> matches wo row order.
        out_rows.append(jnp.concatenate(head_outs, axis=-1))                # (N, C)

    o2d = out_rows[0] if bb == 1 else jnp.concatenate(out_rows, axis=0)     # (rows, C)

    # Output projection: single matmul contracts over (head, head_dim) at once
    # (no (H, N, C) intermediate, no separate head-sum reduction).
    y = jnp.dot(o2d, wo_ref[...].astype(f32),
                preferred_element_type=f32) + bo_ref[...].astype(f32)       # (rows, C)
    o_ref[...] = y.astype(o_ref.dtype)


def attention_forward(x, w_qkv, b_qkv, w_proj, b_proj, *, num_heads,
                      qk_scale=None, param_dtype=jnp.float32, batch_block=None):
    """x: (B, N, C); w_qkv: (3C, C); b_qkv: (3C,); w_proj: (C, C); b_proj: (C,).

    Mirrors Attention.forward with num_classes=None and dropout p=0.
    `param_dtype=jnp.bfloat16` keeps resident weights in bf16 (recommended at real
    sizes on v6e/v7x); the kernel always accumulates in f32.
    """
    B, N, C = x.shape
    assert C % num_heads == 0
    hd = C // num_heads
    scale = float(qk_scale) if qk_scale is not None else float(hd) ** -0.5

    # ---- layout plumbing, done ONCE in the wrapper (not per grid step) ----
    # PyTorch qkv: x @ W.T with output columns ordered (3, H, hd). Fold the softmax
    # scale into the q third of both weight and bias.
    scale_vec = jnp.concatenate([jnp.full((C,), scale, jnp.float32),
                                 jnp.ones((2 * C,), jnp.float32)])           # (3C,)
    wqkv = (w_qkv.astype(jnp.float32).T * scale_vec[None, :]).astype(param_dtype)   # (C, 3C)
    bqkv = (b_qkv.astype(jnp.float32) * scale_vec).reshape(1, 3 * C).astype(param_dtype)
    wo = w_proj.astype(param_dtype).T                                        # (C, C)
    bo = b_proj.astype(param_dtype).reshape(1, C)

    # ---- batch blocking: few, large grid steps; keep >=2 parallel steps when possible
    # so both v7x TensorCores get work (v5e/v6e have a single TC and just see big blocks).
    if batch_block is None:
        batch_block = B
        if B > 1:
            for bb in range(B // 2, 0, -1):
                if B % bb == 0:
                    batch_block = bb
                    break
    assert B % batch_block == 0
    n_steps = B // batch_block
    rows = batch_block * N

    # Dense 2-D row slab; kernel never reshapes/transposes.
    x2d = x.reshape(B * N, C)

    kernel = functools.partial(_attention_kernel, n_tokens=N, num_heads=num_heads)
    const = lambda shape: pl.BlockSpec(shape, lambda i: (0,) * len(shape))

    out2d = pl.pallas_call(
        kernel,
        out_shape=jax.ShapeDtypeStruct((B * N, C), x.dtype),
        grid_spec=pltpu.PrefetchScalarGridSpec(
            num_scalar_prefetch=0,
            grid=(n_steps,),
            in_specs=[
                pl.BlockSpec((rows, C), lambda i: (i, 0)),   # x rows for this step
                const((C, 3 * C)),                           # fused qkv weight (resident)
                const((1, 3 * C)),                           # fused qkv bias   (resident)
                const((C, C)),                               # proj weight      (resident)
                const((1, C)),                               # proj bias        (resident)
            ],
            out_specs=pl.BlockSpec((rows, C), lambda i: (i, 0)),
        ),
        compiler_params=pltpu.CompilerParams(
            dimension_semantics=("parallel",),
            vmem_limit_bytes=32 * 1024 * 1024,
        ),
    )(x2d, wqkv, bqkv, wo, bo)

    return out2d.reshape(B, N, C)


def _reference(x, w_qkv, b_qkv, w_proj, b_proj, num_heads, qk_scale=None):
    """Pure-JAX reference mirroring the PyTorch forward (num_classes=None, no dropout)."""
    B, N, C = x.shape
    hd = C // num_heads
    scale = qk_scale if qk_scale is not None else hd ** -0.5
    hp = lax.Precision.HIGHEST
    qkv = jnp.einsum('bnc,oc->bno', x, w_qkv, precision=hp) + b_qkv        # (B, N, 3C)
    qkv = qkv.reshape(B, N, 3, num_heads, hd).transpose(2, 0, 3, 1, 4)     # (3, B, H, N, hd)
    q, k, v = qkv[0], qkv[1], qkv[2]
    attn = jnp.einsum('bhnd,bhmd->bhnm', q, k, precision=hp) * scale
    attn = jax.nn.softmax(attn, axis=-1)
    out = jnp.einsum('bhnm,bhmd->bhnd', attn, v, precision=hp)
    out = out.transpose(0, 2, 1, 3).reshape(B, N, C)
    return jnp.einsum('bnc,oc->bno', out, w_proj, precision=hp) + b_proj


if __name__ == "__main__":
    B, N, C, H = 2, 8, 32, 4

    key = jax.random.PRNGKey(0)
    kx, kw1, kb1, kw2, kb2 = jax.random.split(key, 5)

    x = jax.random.normal(kx, (B, N, C), dtype=jnp.float32)
    w_qkv = jax.random.normal(kw1, (3 * C, C), dtype=jnp.float32) / jnp.sqrt(C)
    b_qkv = 0.02 * jax.random.normal(kb1, (3 * C,), dtype=jnp.float32)
    w_proj = jax.random.normal(kw2, (C, C), dtype=jnp.float32) / jnp.sqrt(C)
    b_proj = 0.02 * jax.random.normal(kb2, (C,), dtype=jnp.float32)

    out = attention_forward(x, w_qkv, b_qkv, w_proj, b_proj, num_heads=H)
    out = jax.block_until_ready(out)

    ref = _reference(x, w_qkv, b_qkv, w_proj, b_proj, num_heads=H)
    assert out.shape == (B, N, C)
    # Tolerance allows for the approximate EUP reciprocal in the softmax denominator.
    assert jnp.allclose(out, ref, atol=5e-3, rtol=5e-3), "mismatch vs reference"

    print("KERNEL_OK")
</pallas_src>

<mosaic_0001>
module attributes {stable_mosaic.version = 11 : i64} {
  func.func @_attention_kernel(%arg0: i32, %arg1: memref<8x32xf32, #tpu.memory_space<vmem>>, %arg2: memref<32x96xf32, #tpu.memory_space<vmem>>, %arg3: memref<1x96xf32, #tpu.memory_space<vmem>>, %arg4: memref<32x32xf32, #tpu.memory_space<vmem>>, %arg5: memref<1x32xf32, #tpu.memory_space<vmem>>, %arg6: memref<8x32xf32, #tpu.memory_space<vmem>>) attributes {dimension_semantics = [#tpu.dimension_semantics<parallel>], iteration_bounds = array<i64: 2>, scalar_prefetch = 0 : i64, scratch_operands = 0 : i64, tpu.core_type = #tpu.core_type<tc>, window_params = [{transform_indices = @transform_0, window_bounds = array<i64: 8, 32>}, {pipeline_mode = #tpu.pipeline_mode<synchronous>, transform_indices = @transform_1, window_bounds = array<i64: 32, 96>}, {pipeline_mode = #tpu.pipeline_mode<synchronous>, transform_indices = @transform_2, window_bounds = array<i64: 1, 96>}, {pipeline_mode = #tpu.pipeline_mode<synchronous>, transform_indices = @transform_3, window_bounds = array<i64: 32, 32>}, {pipeline_mode = #tpu.pipeline_mode<synchronous>, transform_indices = @transform_4, window_bounds = array<i64: 1, 32>}, {transform_indices = @transform_5, window_bounds = array<i64: 8, 32>}]} {
    %c0 = arith.constant 0 : index
    %c0_0 = arith.constant 0 : index
    %0 = vector.load %arg1[%c0, %c0_0] : memref<8x32xf32, #tpu.memory_space<vmem>>, vector<8x32xf32>
    %c0_1 = arith.constant 0 : index
    %c0_2 = arith.constant 0 : index
    %1 = vector.load %arg2[%c0_1, %c0_2] : memref<32x96xf32, #tpu.memory_space<vmem>>, vector<32x96xf32>
    %cst = arith.constant dense<0.000000e+00> : vector<8x96xf32>
    %2 = tpu.matmul %0, %1, %cst {dimension_numbers = #tpu.dot_dimension_numbers<[1], [0], [0], [1], [0, 0, 1, 1], [], []>} : vector<8x32xf32>, vector<32x96xf32>, vector<8x96xf32> -> vector<8x96xf32>
    %c0_3 = arith.constant 0 : index
    %c0_4 = arith.constant 0 : index
    %3 = vector.load %arg3[%c0_3, %c0_4] : memref<1x96xf32, #tpu.memory_space<vmem>>, vector<1x96xf32>
    %4 = vector.broadcast %3 : vector<1x96xf32> to vector<8x96xf32>
    %5 = arith.addf %2, %4 : vector<8x96xf32>
    %6 = vector.extract_strided_slice %5 {offsets = [0, 0], sizes = [8, 8], strides = [1, 1]} : vector<8x96xf32> to vector<8x8xf32>
    %7 = vector.extract_strided_slice %5 {offsets = [0, 32], sizes = [8, 8], strides = [1, 1]} : vector<8x96xf32> to vector<8x8xf32>
    %8 = vector.extract_strided_slice %5 {offsets = [0, 64], sizes = [8, 8], strides = [1, 1]} : vector<8x96xf32> to vector<8x8xf32>
    %cst_5 = arith.constant dense<0.000000e+00> : vector<8x8xf32>
    %9 = tpu.matmul %6, %7, %cst_5 {dimension_numbers = #tpu.dot_dimension_numbers<[1], [1], [0], [0], [0, 0, 1, 0], [], []>} : vector<8x8xf32>, vector<8x8xf32>, vector<8x8xf32> -> vector<8x8xf32>
    %cst_6 = arith.constant dense<0xFF800000> : vector<8xf32>
    %10 = vector.multi_reduction <maximumf>, %9, %cst_6 [1] : vector<8x8xf32> to vector<8xf32>
    %11 = vector.shape_cast %10 : vector<8xf32> to vector<8x1xf32>
    %12 = vector.broadcast %11 : vector<8x1xf32> to vector<8x8xf32>
    %13 = arith.subf %9, %12 : vector<8x8xf32>
    %14 = math.exp %13 : vector<8x8xf32>
    %cst_7 = arith.constant dense<0.000000e+00> : vector<8xf32>
    %15 = vector.multi_reduction <add>, %14, %cst_7 [1] : vector<8x8xf32> to vector<8xf32>
    %16 = vector.shape_cast %15 : vector<8xf32> to vector<8x1xf32>
    %17 = tpu.reciprocal %16 {approx = true} : vector<8x1xf32> -> vector<8x1xf32>
    %18 = vector.broadcast %17 : vector<8x1xf32> to vector<8x8xf32>
    %19 = arith.mulf %14, %18 : vector<8x8xf32>
    %cst_8 = arith.constant dense<0.000000e+00> : vector<8x8xf32>
    %20 = tpu.matmul %19, %8, %cst_8 {dimension_numbers = #tpu.dot_dimension_numbers<[1], [0], [0], [1], [0, 0, 1, 1], [], []>} : vector<8x8xf32>, vector<8x8xf32>, vector<8x8xf32> -> vector<8x8xf32>
    %21 = vector.extract_strided_slice %5 {offsets = [0, 8], sizes = [8, 8], strides = [1, 1]} : vector<8x96xf32> to vector<8x8xf32>
    %22 = vector.extract_strided_slice %5 {offsets = [0, 40], sizes = [8, 8], strides = [1, 1]} : vector<8x96xf32> to vector<8x8xf32>
    %23 = vector.extract_strided_slice %5 {offsets = [0, 72], sizes = [8, 8], strides = [1, 1]} : vector<8x96xf32> to vector<8x8xf32>
    %cst_9 = arith.constant dense<0.000000e+00> : vector<8x8xf32>
    %24 = tpu.matmul %21, %22, %cst_9 {dimension_numbers = #tpu.dot_dimension_numbers<[1], [1], [0], [0], [0, 0, 1, 0], [], []>} : vector<8x8xf32>, vector<8x8xf32>, vector<8x8xf32> -> vector<8x8xf32>
    %cst_10 = arith.constant dense<0xFF800000> : vector<8xf32>
    %25 = vector.multi_reduction <maximumf>, %24, %cst_10 [1] : vector<8x8xf32> to vector<8xf32>
    %26 = vector.shape_cast %25 : vector<8xf32> to vector<8x1xf32>
    %27 = vector.broadcast %26 : vector<8x1xf32> to vector<8x8xf32>
    %28 = arith.subf %24, %27 : vector<8x8xf32>
    %29 = math.exp %28 : vector<8x8xf32>
    %cst_11 = arith.constant dense<0.000000e+00> : vector<8xf32>
    %30 = vector.multi_reduction <add>, %29, %cst_11 [1] : vector<8x8xf32> to vector<8xf32>
    %31 = vector.shape_cast %30 : vector<8xf32> to vector<8x1xf32>
    %32 = tpu.reciprocal %31 {approx = true} : vector<8x1xf32> -> vector<8x1xf32>
    %33 = vector.broadcast %32 : vector<8x1xf32> to vector<8x8xf32>
    %34 = arith.mulf %29, %33 : vector<8x8xf32>
    %cst_12 = arith.constant dense<0.000000e+00> : vector<8x8xf32>
    %35 = tpu.matmul %34, %23, %cst_12 {dimension_numbers = #tpu.dot_dimension_numbers<[1], [0], [0], [1], [0, 0, 1, 1], [], []>} : vector<8x8xf32>, vector<8x8xf32>, vector<8x8xf32> -> vector<8x8xf32>
    %36 = vector.extract_strided_slice %5 {offsets = [0, 16], sizes = [8, 8], strides = [1, 1]} : vector<8x96xf32> to vector<8x8xf32>
    %37 = vector.extract_strided_slice %5 {offsets = [0, 48], sizes = [8, 8], strides = [1, 1]} : vector<8x96xf32> to vector<8x8xf32>
    %38 = vector.extract_strided_slice %5 {offsets = [0, 80], sizes = [8, 8], strides = [1, 1]} : vector<8x96xf32> to vector<8x8xf32>
    %cst_13 = arith.constant dense<0.000000e+00> : vector<8x8xf32>
    %39 = tpu.matmul %36, %37, %cst_13 {dimension_numbers = #tpu.dot_dimension_numbers<[1], [1], [0], [0], [0, 0, 1, 0], [], []>} : vector<8x8xf32>, vector<8x8xf32>, vector<8x8xf32> -> vector<8x8xf32>
    %cst_14 = arith.constant dense<0xFF800000> : vector<8xf32>
    %40 = vector.multi_reduction <maximumf>, %39, %cst_14 [1] : vector<8x8xf32> to vector<8xf32>
    %41 = vector.shape_cast %40 : vector<8xf32> to vector<8x1xf32>
    %42 = vector.broadcast %41 : vector<8x1xf32> to vector<8x8xf32>
    %43 = arith.subf %39, %42 : vector<8x8xf32>
    %44 = math.exp %43 : vector<8x8xf32>
    %cst_15 = arith.constant dense<0.000000e+00> : vector<8xf32>
    %45 = vector.multi_reduction <add>, %44, %cst_15 [1] : vector<8x8xf32> to vector<8xf32>
    %46 = vector.shape_cast %45 : vector<8xf32> to vector<8x1xf32>
    %47 = tpu.reciprocal %46 {approx = true} : vector<8x1xf32> -> vector<8x1xf32>
    %48 = vector.broadcast %47 : vector<8x1xf32> to vector<8x8xf32>
    %49 = arith.mulf %44, %48 : vector<8x8xf32>
    %cst_16 = arith.constant dense<0.000000e+00> : vector<8x8xf32>
    %50 = tpu.matmul %49, %38, %cst_16 {dimension_numbers = #tpu.dot_dimension_numbers<[1], [0], [0], [1], [0, 0, 1, 1], [], []>} : vector<8x8xf32>, vector<8x8xf32>, vector<8x8xf32> -> vector<8x8xf32>
    %51 = vector.extract_strided_slice %5 {offsets = [0, 24], sizes = [8, 8], strides = [1, 1]} : vector<8x96xf32> to vector<8x8xf32>
    %52 = vector.extract_strided_slice %5 {offsets = [0, 56], sizes = [8, 8], strides = [1, 1]} : vector<8x96xf32> to vector<8x8xf32>
    %53 = vector.extract_strided_slice %5 {offsets = [0, 88], sizes = [8, 8], strides = [1, 1]} : vector<8x96xf32> to vector<8x8xf32>
    %cst_17 = arith.constant dense<0.000000e+00> : vector<8x8xf32>
    %54 = tpu.matmul %51, %52, %cst_17 {dimension_numbers = #tpu.dot_dimension_numbers<[1], [1], [0], [0], [0, 0, 1, 0], [], []>} : vector<8x8xf32>, vector<8x8xf32>, vector<8x8xf32> -> vector<8x8xf32>
    %cst_18 = arith.constant dense<0xFF800000> : vector<8xf32>
    %55 = vector.multi_reduction <maximumf>, %54, %cst_18 [1] : vector<8x8xf32> to vector<8xf32>
    %56 = vector.shape_cast %55 : vector<8xf32> to vector<8x1xf32>
    %57 = vector.broadcast %56 : vector<8x1xf32> to vector<8x8xf32>
    %58 = arith.subf %54, %57 : vector<8x8xf32>
    %59 = math.exp %58 : vector<8x8xf32>
    %cst_19 = arith.constant dense<0.000000e+00> : vector<8xf32>
    %60 = vector.multi_reduction <add>, %59, %cst_19 [1] : vector<8x8xf32> to vector<8xf32>
    %61 = vector.shape_cast %60 : vector<8xf32> to vector<8x1xf32>
    %62 = tpu.reciprocal %61 {approx = true} : vector<8x1xf32> -> vector<8x1xf32>
    %63 = vector.broadcast %62 : vector<8x1xf32> to vector<8x8xf32>
    %64 = arith.mulf %59, %63 : vector<8x8xf32>
    %cst_20 = arith.constant dense<0.000000e+00> : vector<8x8xf32>
    %65 = tpu.matmul %64, %53, %cst_20 {dimension_numbers = #tpu.dot_dimension_numbers<[1], [0], [0], [1], [0, 0, 1, 1], [], []>} : vector<8x8xf32>, vector<8x8xf32>, vector<8x8xf32> -> vector<8x8xf32>
    %66 = tpu.concatenate %20, %35, %50, %65 in 1 : vector<8x8xf32>, vector<8x8xf32>, vector<8x8xf32>, vector<8x8xf32> -> vector<8x32xf32>
    %c0_21 = arith.constant 0 : index
    %c0_22 = arith.constant 0 : index
    %67 = vector.load %arg4[%c0_21, %c0_22] : memref<32x32xf32, #tpu.memory_space<vmem>>, vector<32x32xf32>
    %cst_23 = arith.constant dense<0.000000e+00> : vector<8x32xf32>
    %68 = tpu.matmul %66, %67, %cst_23 {dimension_numbers = #tpu.dot_dimension_numbers<[1], [0], [0], [1], [0, 0, 1, 1], [], []>} : vector<8x32xf32>, vector<32x32xf32>, vector<8x32xf32> -> vector<8x32xf32>
    %c0_24 = arith.constant 0 : index
    %c0_25 = arith.constant 0 : index
    %69 = vector.load %arg5[%c0_24, %c0_25] : memref<1x32xf32, #tpu.memory_space<vmem>>, vector<1x32xf32>
    %70 = vector.broadcast %69 : vector<1x32xf32> to vector<8x32xf32>
    %71 = arith.addf %68, %70 : vector<8x32xf32>
    %c0_26 = arith.constant 0 : index
    %c0_27 = arith.constant 0 : index
    %72 = vector.load %arg6[%c0_26, %c0_27] : memref<8x32xf32, #tpu.memory_space<vmem>>, vector<8x32xf32>
    tpu.vector_store %arg6[%c0_26, %c0_27], %71 {strides = array<i32>} : memref<8x32xf32, #tpu.memory_space<vmem>>, vector<8x32xf32>,
    return
  }
  func.func @transform_0(%arg0: i32) -> (i32, i32) {
    %c0_i32 = arith.constant 0 : i32
    %c0_i32_0 = arith.constant 0 : i32
    return %arg0, %c0_i32 : i32, i32
  }
  func.func @transform_1(%arg0: i32) -> (i32, i32) {
    %c0_i32 = arith.constant 0 : i32
    %c0_i32_0 = arith.constant 0 : i32
    %c0_i32_1 = arith.constant 0 : i32
    return %c0_i32, %c0_i32_0 : i32, i32
  }
  func.func @transform_2(%arg0: i32) -> (i32, i32) {
    %c0_i32 = arith.constant 0 : i32
    %c0_i32_0 = arith.constant 0 : i32
    %c0_i32_1 = arith.constant 0 : i32
    return %c0_i32, %c0_i32_0 : i32, i32
  }
  func.func @transform_3(%arg0: i32) -> (i32, i32) {
    %c0_i32 = arith.constant 0 : i32
    %c0_i32_0 = arith.constant 0 : i32
    %c0_i32_1 = arith.constant 0 : i32
    return %c0_i32, %c0_i32_0 : i32, i32
  }
  func.func @transform_4(%arg0: i32) -> (i32, i32) {
    %c0_i32 = arith.constant 0 : i32
    %c0_i32_0 = arith.constant 0 : i32
    %c0_i32_1 = arith.constant 0 : i32
    return %c0_i32, %c0_i32_0 : i32, i32
  }
  func.func @transform_5(%arg0: i32) -> (i32, i32) {
    %c0_i32 = arith.constant 0 : i32
    %c0_i32_0 = arith.constant 0 : i32
    return %arg0, %c0_i32 : i32, i32
  }
}

</mosaic_0001>

<bundles_post_ra>
// kernel: tpu_custom_call.1
= control target key start
LH: loop header
LB: loop body
LE: loop exit
PB: predicated region body
PF: predicated region fallthrough
CT: control target
= control target key end

     0   :  { %10 = vsyncpa [#allocation3], 0  ;;  %s1256_s0 = inlined_call_operand.hbm [shape: f32[16,32], index: 0, kind: input, shape index: {}]   ;;  %s1257_s1 = inlined_call_operand.hbm [shape: f32[32,96], index: 1, kind: input, shape index: {}]   ;;  %s1258_s2 = inlined_call_operand.vmem [shape: f32[1,96], index: 2, kind: input, shape index: {}]   ;;  %s1259_s3 = inlined_call_operand.hbm [shape: f32[32,32], index: 3, kind: input, shape index: {}]   ;;  %s1260_s4 = inlined_call_operand.vmem [shape: f32[1,32], index: 4, kind: input, shape index: {}]   ;;  %s1261_s5 = inlined_call_operand.hbm [shape: f32[16,32], index: 5, kind: output, shape index: {}]  }
   0x1   :  { %12 = vsyncpa [#allocation3 + $0x1], 0 }
   0x2   :  { %13 = vsyncpa [#allocation6], 0 }
   0x3   :  { %14 = vsyncpa [#allocation4], 0 }
   0x4   :  { %16 = vsyncpa [#allocation4 + $0x1], 0  ;;  %s1063_s18 = smov 0   ;;  %s1065_s19 = smov 0  }
   0x5   :  { %s1067_s20 = smov 0   ;;  %s1069_s21 = smov 0  }
   0x6 LB: > { %s174_s24 = sshll.u32 %s1257_s1, 4  ;;  %s1087_s25 = sadd.s32 4294967295, %s1013_s21   ;;  %s1013_s21 = sphi %s1069_s21, %s1272_s21   ;;  %s1009_s20 = sphi %s1067_s20, %s1271_s20   ;;  %s1005_s19 = sphi %s1065_s19, %s1270_s19   ;;  %s1001_s18 = sphi %s1063_s18, %s1269_s18   ;;  %s175_s24 = int_to_ptr.hbm [resolvable:$true] %s174_s24 }
   0x7   : > { %p723_p0 = scmp.ge.s32.totalorder %s1013_s21, 1  ;;  %p43_p1 = scmp.eq.s32.totalorder %s1087_s25, 0 }
   0x8   : > { %p163_p2 = scmp.lt.s32.totalorder %s1013_s21, 3  ;;  %s1015_s27 = smov [#allocation5]  }
   0x9   : > { %s176_s28 = sshll.u32 %s1015_s27, 4  ;;  %s191_s6 = sshll.u32 %s1259_s3, 4  ;;  %s177_s28 = int_to_ptr.vmem [resolvable:$true] %s176_s28  ;;  %s192_s6 = int_to_ptr.hbm [resolvable:$true] %s191_s6 }
   0xa   : > { %p1092_p3 = pnand %p723_p0, %p163_p2  ;;  %s1016_s7 = smov [#allocation7]  }
   0xb   : > { %s193_s8 = sshll.u32 %s1016_s7, 4  ;;  %s1017_s9 = smov 128   ;;  %s194_s8 = int_to_ptr.vmem [resolvable:$true] %s193_s8 }
   0xc   : > { %p764_p4 = pneg %p1092_p3  ;;  %s1018_s10 = smov 8  }
   0xd   : > { %s722_s11 = sadd.s32 4294967294, %s1013_s21   ;;  %s1106_s12 = sadd.s32 1, %s1013_s21  }
   0xe   : > { %p765_p6 = pnand %p764_p4, %p43_p1  ;;  %s26_s13 = ssub.s32 %s1013_s21, %s1106_s12 }
   0xf   : > { %s29_s14 = sadd.s32 1, %s1009_s20  ;;  %p27_p7 = scmp.eq.s32.totalorder %s26_s13, 0 }
  0x10   : > { %767 = dma.hbm_to_vmem [thread:$0]  (!%p765_p6), %s175_s24, 512, %s177_s28, [#allocation6], %s1017_s9, %s1017_s9, %s1018_s10  }
  0x11   : > { %770 = dma.hbm_to_vmem [thread:$0]  (!%p765_p6), %s192_s6, 512, %s194_s8, [#allocation6], %s1017_s9, %s1017_s9, %s1018_s10  }
  0x12   : > { %p36_p8 = scmp.ne.s32.totalorder %s1009_s20, %s1005_s19  ;;  %p37_p9 = scmp.eq.s32.totalorder %s1013_s21, 0 }
  0x13   : > { %p42_p10 = scmp.ne.s32.totalorder %s1005_s19, %s1001_s18  ;;  %p150_p13 = scmp.eq.s32.totalorder %s1087_s25, 1 }
  0x14   : > { %s1117_s15 = scalar_select %p27_p7, %s1009_s20, %s29_s14  }
  0x15   : > { %p1119_p11 = por %p37_p9, %p36_p8  ;;  %p1125_p12 = por %p43_p1, %p42_p10 }
  0x16   : > { %p156_p0 = scmp.eq.s32.totalorder %s722_s11, 1  ;;  %p781_p2 = scmp.lt.s32.totalorder %s1013_s21, 2 }
  0x17   : > { %s210_s22 = sand.u32 1, %s1009_s20   ;;  %p1132_p4 = por %p150_p13, %p36_p8 }
  0x18   : > { %p1136_p6 = por %p156_p0, %p42_p10  ;;  %s727_s27 = sshll.u32 %s210_s22, 3 }
  0x19   : > { %s728_s28 = sshll.u32 %s1013_s21, 3  ;;  %s214_s7 = scalar_lea.vmem [#allocation2], %s727_s27 }
  0x1a   : > { %s218_s6 = scalar_lea.hbm %s1256_s0, %s728_s28  ;;  %s222_s8 = sshll.u32 %s214_s7, 4  ;;  %s223_s8 = int_to_ptr.vmem [resolvable:$true] %s222_s8 }
  0x1b   : > { %s220_s9 = sshll.u32 %s218_s6, 4  ;;  %p1146_p7 = pnand %p781_p2, %p1119_p11  ;;  %s221_s9 = int_to_ptr.hbm [resolvable:$true] %s220_s9 }
  0x1c   : > { %s211_s11 = scalar_lea.sflag [#allocation3], %s210_s22  ;;  %s913_s13 = sshra.s32 %s221_s9, 4  ;;  %s914_s13 = int_to_ptr.hbm [resolvable:$true] %s913_s13 }
  0x1d   : > { %s915_s14 = scalar_lea.hbm %s914_s13, 8  ;;  %p917_p9 = pneg %p1146_p7 }
  0x1e   : > { %p916_p8 = scmp.ne.s32.totalorder %s914_s13, %s915_s14  ;;  %s920_s29 = scalar_lea.hbm %s1256_s0, 16 }
  0x1f   : > { %p921_p11 = scmp.lt.s32.totalorder %s914_s13, %s1256_s0  ;;  %p922_p0 = scmp.lt.s32.totalorder %s920_s29, %s915_s14 }
  0x20   : > { %p918_p10 = pnand %p917_p9, %p916_p8 }
  0x21   : > { %p923_p2 = por %p922_p0, %p921_p11 }
  0x22   : > { %p919_p13 = pneg %p918_p10 }
  0x24   : > { %p924_p5 = pnand %p923_p2, %p919_p13 }
  0x26   : > { %927 = shalt.err (!%p924_p5)
}
  0x27   : > { %774 = dma.hbm_to_vmem [thread:$0]  (!%p1146_p7), %s221_s9, 128, %s223_s8, %s211_s11  }
  0x28   : > { %231 = sbr.rel (%p1092_p3) target bundleno = 1100 (0x44c), region = 40  ;;  %s1163_s22 = sand.u32 (!%p1092_p3), 1, %s1005_s19  }
  0x29   : > { %s730_s6 = sshll.u32 (!%p1092_p3), %s1163_s22, 3  ;;  %s234_s7 = scalar_lea.sflag (!%p1092_p3), [#allocation3], %s1163_s22 }
  0x2a   : > { %s237_s13 = scalar_lea.vmem (!%p1092_p3), [#allocation2], %s730_s6 }
  0x2d   : > { %988 = dma.done.wait (%p1125_p12), %s234_s7, 128  }
  0x2e   : > { %990 = vsyncadd (%p1125_p12), %s234_s7, 4294967168 }
  0x2f   : > { %992 = dma.done.wait (%p43_p1), [#allocation6], 1024  }
  0x30   : > { %994 = vsyncadd (%p43_p1), [#allocation6], 4294966272  ;;  %v279_v0 = vld [vmem:[#allocation5 + $0x18] sm:$0xff]  ;;  %v278_v1 = vld [vmem:[#allocation5 + $0x10] sm:$0xff]  ;;  %vm284_vm0 = vcmask 261120   ;;  %s1019_s8 = smov 72  }
  0x31   : > { %300 = vmatpush.msra.mxu0 %v279_v0  ;;  %v277_v2 = vld [vmem:[#allocation5 + $0x8] sm:$0xff]  ;;  %v276_v3 = vld [vmem:[#allocation5] sm:$0xff]  ;;  %v275_v4 = vld [vmem:[%s237_s13] sm:$0xff]  ;;  %s1020_s9 = smov 120   ;;  %s1021_s10 = smov 96   ;;  %vm311_vm1 = vcmask 64512  }
  0x32   : > { %v835_v5 = vld [vmem:[%s1258_s2] ss:$0 sm:$0xff]  ;;  %s1022_s11 = smov 112   ;;  %s1023_s14 = smov 80   ;;  %v588_v63 = vld [vmem:[#allocation7 + $0x18] sm:$0xff]  ;;  %vm581_vm2 = vcmask 130048  }
  0x33   : > { %301 = vmatpush.msra.mxu0 %v278_v1  ;;  %s1024_s27 = smov 88   ;;  %s1025_s28 = smov 104   ;;  %v587_v0 = vld [vmem:[#allocation7 + $0x10] sm:$0xff]  ;;  %v586_v1 = vld [vmem:[#allocation7 + $0x8] sm:$0xff]  ;;  %vm583_vm3 = vcmask 195584  }
  0x34   : > { %s1026_s29 = smov 64   ;;  %s1027_s30 = smov 40  }
  0x35   : > { %302 = vmatpush.msra.mxu0 %v277_v2  ;;  %s1028_s16 = smov 56   ;;  %s1029_s7 = smov 48   ;;  %v585_v2 = vld [vmem:[#allocation7] sm:$0xff] }
  0x36   : > { %s1030_s13 = smov 16   ;;  %s1031_s26 = smov 8  }
  0x37   : > { %303 = vmatpush.msra.mxu0 %v276_v3  ;;  %s1032_s17 = smov 24  }
  0x38   : > { %734 = vmatmul.msk.f32.vlgmr.msra.gmra.mxu0 %vm284_vm0, %v275_v4 }
  0xb5   : > { %v305_v6 = vpop.f32.mrf.mxu0 }
  0xb6   : > { %v1181_v7 = vadd.f32 %v835_v5, %v305_v6 }
  0xb8   : > { %505 = vrot.lane.b32.xlu2 %v1181_v7, %s1019_s8  ;;  %373 = vrot.lane.b32.xlu1 %v1181_v7, %s1020_s9  ;;  %s749_s8 = sshll.u32 %s1087_s25, 3  ;;  %s618_s25 = scalar_lea.sflag [#allocation4], %s1163_s22 }
  0xb9   : > { %309 = vrot.lane.b32.xlu0 %v1181_v7, %s1021_s10 }
  0xc0   : > { %438 = vrot.lane.b32.xlu2 %v1181_v7, %s1022_s11  ;;  %440 = vrot.lane.b32.xlu1 %v1181_v7, %s1023_s14  ;;  %s628_s11 = scalar_lea.hbm %s1261_s5, %s749_s8 }
  0xc1   : > { %375 = vrot.lane.b32.xlu0 %v1181_v7, %s1024_s27 }
  0xc9   : > { %503 = vrot.lane.b32.xlu0 %v1181_v7, %s1025_s28  ;;  %s274_s28 = scalar_lea.vmem [#allocation8], %s730_s6  ;;  %s963_s6 = scalar_lea.hbm %s1261_s5, 16 }
 0x112   : > { %v506_v8 = vpop.permute.xlu2 %505 }
 0x113   : > { %744 = vmatpush.xpose.msk.msrb.mxu0 %vm311_vm1, %v506_v8 }
 0x11a   : > { %v439_v13 = vpop.permute.xlu2 %438 }
 0x12a   : > { %v374_v9 = vpop.permute.xlu1 %373 }
 0x12b   : > { %v310_v10 = vpop.permute.xlu0 %309 }
 0x12c   : > { %735 = vmatpush.xpose.msk.msra.mxu1 %vm311_vm1, %v310_v10 }
 0x12f   : > { %736 = vmatmul.msk.f32.vlgmr.msra.gmra.mxu1 %vm311_vm1, %v1181_v7 }
 0x132   : > { %v441_v11 = vpop.permute.xlu1 %440 }
 0x133   : > { %v376_v12 = vpop.permute.xlu0 %375  ;;  %741 = vmatpush.xpose.msk.msrb.mxu1 %vm311_vm1, %v441_v11 }
 0x134   : > { %738 = vmatpush.xpose.msk.msra.mxu3 %vm311_vm1, %v376_v12 }
 0x137   : > { %739 = vmatmul.msk.f32.vlgmr.msra.gmra.mxu3 %vm311_vm1, %v374_v9  ;;  %742 = vmatmul.msk.f32.vlgmr.msrb.gmra.mxu1 %vm311_vm1, %v439_v13  ;;  %v836_v9 = vld [vmem:[%s1260_s4] ss:$0 sm:$0xff] }
 0x138   : > { %608 = vmatpush.msra.mxu1 %v588_v63 }
 0x13a   : > { %609 = vmatpush.msra.mxu1 %v587_v0 }
 0x13b   : > { %v504_v14 = vpop.permute.xlu0 %503 }
 0x13c   : > { %745 = vmatmul.msk.f32.vlgmr.msrb.gmra.mxu0 %vm311_vm1, %v504_v14  ;;  %610 = vmatpush.msra.mxu1 %v586_v1 }
 0x13e   : > { %611 = vmatpush.msra.mxu1 %v585_v2 }
 0x1ac   : > { %v333_v15 = vpop.f32.mrf.mxu1 }
 0x1ad   : > { %v336_v16 = vsel %vm311_vm1, %v333_v15, -inf }
 0x1ae   : > { %337 = vmax.xlane.f32.xlu1 %v336_v16 }
 0x1b4   : > { %v463_v17 = vpop.f32.mrf.mxu1 }
 0x1b5   : > { %v466_v18 = vsel %vm311_vm1, %v463_v17, -inf }
 0x1b6   : > { %467 = vmax.xlane.f32.xlu0 %v466_v18 }
 0x1b9   : > { %v528_v21 = vpop.f32.mrf.mxu0 }
 0x1ba   : > { %v398_v19 = vpop.f32.mrf.mxu3  ;;  %v531_v22 = vsel %vm311_vm1, %v528_v21, -inf }
 0x1bb   : > { %v401_v20 = vsel %vm311_vm1, %v398_v19, -inf }
 0x1bc   : > { %402 = vmax.xlane.f32.xlu2 %v401_v20 }
 0x1c4   : > { %532 = vmax.xlane.f32.xlu2 %v531_v22 }
 0x1ca   : > { %347 = vrot.lane.b32.xlu0 %v1181_v7, %s1026_s29  ;;  %s630_s29 = sshll.u32 %s274_s28, 4  ;;  %s631_s29 = int_to_ptr.vmem [resolvable:$true] %s630_s29 }
 0x1d2   : > { %542 = vrot.lane.b32.xlu0 %v1181_v7, %s1027_s30  ;;  %s632_s30 = sshll.u32 %s628_s11, 4  ;;  %s633_s30 = int_to_ptr.hbm [resolvable:$true] %s632_s30 }
 0x221   : > { %v338_v23 = vpop.xlane.xlu1 %337 }
 0x222   : > { %v339_v24 = vsub.f32 %v333_v15, %v338_v23 }
 0x224   : > { %v340_v25 = vmul.f32 1.442695, %v339_v24 }
 0x226   : > { %837 = vpow2.f32 %v340_v25 }
 0x229   : > { %v468_v26 = vpop.xlane.xlu0 %467 }
 0x22a   : > { %v469_v27 = vsub.f32 %v463_v17, %v468_v26 }
 0x22c   : > { %v838_v28 = vpop.eup %837  ;;  %v470_v29 = vmul.f32 1.442695, %v469_v27 }
 0x22d   : > { %v342_v30 = vsel %vm311_vm1, %v838_v28, 0.0 }
 0x22e   : > { %839 = vpow2.f32 %v470_v29  ;;  %343 = vadd.xlane.f32.xlu1 %v342_v30 }
 0x22f   : > { %v403_v31 = vpop.xlane.xlu2 %402 }
 0x230   : > { %v404_v36 = vsub.f32 %v398_v19, %v403_v31 }
 0x232   : > { %v405_v39 = vmul.f32 1.442695, %v404_v36 }
 0x234   : > { %v840_v32 = vpop.eup %839 }
 0x235   : > { %v472_v33 = vsel %vm311_vm1, %v840_v32, 0.0 }
 0x236   : > { %473 = vadd.xlane.f32.xlu1 %v472_v33 }
 0x237   : > { %v533_v34 = vpop.xlane.xlu2 %532 }
 0x238   : > { %v534_v35 = vsub.f32 %v528_v21, %v533_v34 }
 0x23a   : > { %v535_v37 = vmul.f32 1.442695, %v534_v35 }
 0x23c   : > { %841 = vpow2.f32 %v535_v37  ;;  %v348_v38 = vpop.permute.xlu0 %347 }
 0x23d   : > { %368 = vmatpush.msra.mxu2 %v348_v38  ;;  %843 = vpow2.f32 %v405_v39 }
 0x242   : > { %v842_v40 = vpop.eup %841 }
 0x243   : > { %v537_v41 = vsel %vm311_vm1, %v842_v40, 0.0  ;;  %v844_v42 = vpop.eup %843 }
 0x244   : > { %538 = vadd.xlane.f32.xlu2 %v537_v41  ;;  %v407_v43 = vsel %vm311_vm1, %v844_v42, 0.0  ;;  %v543_v51 = vpop.permute.xlu0 %542 }
 0x24c   : > { %408 = vadd.xlane.f32.xlu2 %v407_v43 }
 0x24f   : > { %412 = vrot.lane.b32.xlu1 %v1181_v7, %s1028_s16  ;;  %s957_s16 = sshra.s32 %s633_s30, 4  ;;  %s958_s16 = int_to_ptr.hbm [resolvable:$true] %s957_s16 }
 0x250   : > { %p964_p12 = scmp.lt.s32.totalorder %s958_s16, %s1261_s5 }
 0x264   : > { %477 = vrot.lane.b32.xlu2 %v1181_v7, %s1029_s7  ;;  %s959_s7 = scalar_lea.hbm %s958_s16, 8 }
 0x265   : > { %p960_p1 = scmp.ne.s32.totalorder %s958_s16, %s959_s7  ;;  %p965_p7 = scmp.lt.s32.totalorder %s963_s6, %s959_s7 }
 0x267   : > { %p961_p3 = pnand %p960_p1, %p1132_p4  ;;  %p966_p8 = por %p965_p7, %p964_p12 }
 0x269   : > { %p962_p5 = pneg %p961_p3 }
 0x26b   : > { %p967_p9 = pnand %p966_p8, %p962_p5 }
 0x2a1   : > { %v344_v44 = vpop.xlane.xlu1 %343 }
 0x2a2   : > { %845 = vrcp.f32 %v344_v44 }
 0x2a8   : > { %v846_v45 = vpop.eup %845 }
 0x2a9   : > { %v346_v46 = vmul.f32 %v846_v45, %v838_v28  ;;  %v474_v48 = vpop.xlane.xlu1 %473 }
 0x2aa   : > { %847 = vrcp.f32 %v474_v48 }
 0x2ab   : > { %737 = vmatmul.msk.f32.vlgmr.msra.gmra.mxu2 %vm311_vm1, %v346_v46 }
 0x2b0   : > { %v848_v52 = vpop.eup %847 }
 0x2b1   : > { %v476_v56 = vmul.f32 %v848_v52, %v840_v32 }
 0x2b7   : > { %v539_v47 = vpop.xlane.xlu2 %538 }
 0x2bf   : > { %v409_v49 = vpop.xlane.xlu2 %408 }
 0x2c0   : > { %849 = vrcp.f32 %v409_v49 }
 0x2c1   : > { %v413_v50 = vpop.permute.xlu1 %412  ;;  %851 = vrcp.f32 %v539_v47 }
 0x2c2   : > { %433 = vmatpush.msrb.mxu2 %v413_v50 }
 0x2c4   : > { %563 = vmatpush.msra.mxu2 %v543_v51 }
 0x2c6   : > { %v850_v53 = vpop.eup %849 }
 0x2c7   : > { %v478_v54 = vpop.permute.xlu2 %477  ;;  %v411_v55 = vmul.f32 %v850_v53, %v844_v42  ;;  %v852_v57 = vpop.eup %851 }
 0x2c8   : > { %498 = vmatpush.msrb.mxu3 %v478_v54  ;;  %v541_v58 = vmul.f32 %v852_v57, %v842_v40 }
 0x2c9   : > { %740 = vmatmul.msk.f32.vlgmr.msrb.gmra.mxu2 %vm311_vm1, %v411_v55  ;;  %743 = vmatmul.msk.f32.vlgmr.msrb.gmra.mxu3 %vm311_vm1, %v476_v56 }
 0x2d1   : > { %746 = vmatmul.msk.f32.vlgmr.msra.gmra.mxu2 %vm311_vm1, %v541_v58 }
 0x32e   : > { %v370_v59 = vpop.f32.mrf.mxu2 }
 0x34c   : > { %v435_v60 = vpop.f32.mrf.mxu2  ;;  %v500_v61 = vpop.f32.mrf.mxu3 }
 0x34d   : > { %573 = vrot.lane.b32.xlu1 %v500_v61, %s1030_s13  ;;  %569 = vrot.lane.b32.xlu0 %v435_v60, %s1031_s26 }
 0x354   : > { %v565_v62 = vpop.f32.mrf.mxu2 }
 0x355   : > { %577 = vrot.lane.b32.xlu0 %v565_v62, %s1032_s17 }
 0x3bf   : > { %v570_v3 = vpop.permute.xlu0 %569  ;;  %v574_v4 = vpop.permute.xlu1 %573 }
 0x3c0   : > { %v580_v5 = vsel %vm311_vm1, %v370_v59, %v570_v3 }
 0x3c1   : > { %v582_v6 = vsel %vm581_vm2, %v580_v5, %v574_v4 }
 0x3c7   : > { %v578_v7 = vpop.permute.xlu0 %577 }
 0x3c8   : > { %v584_v8 = vsel %vm583_vm3, %v582_v6, %v578_v7 }
 0x3c9   : > { %747 = vmatmul.msk.f32.vlgmr.msra.gmra.mxu1 %vm284_vm0, %v584_v8 }
 0x446   : > { %v613_v10 = vpop.f32.mrf.mxu1 }
 0x447   : > { %v614_v11 = vadd.f32 %v836_v9, %v613_v10 }
 0x449   : > { %616 = vst.msk [vmem:[%s274_s28] sm:$0xff] %vm284_vm0, %v614_v11 }
 0x44a   : > { %970 = shalt.err (!%p967_p9)
}
 0x44b   : > { %762 = dma.vmem_to_hbm [thread:$0]  (%p1132_p4), %s631_s29, 128, %s633_s30, %s618_s25  }
 0x44c PF: > { %s644_s22 = sand.u32 1, %s1001_s18   ;;  %p1268_p10 = scmp.ge.s32.totalorder %s1013_s21, 2 }
 0x44d   : > { %s645_s9 = scalar_lea.sflag [#allocation4], %s644_s22 }
 0x44e   : > { %p776_p13 = pnand %p1268_p10, %p1136_p6 }
 0x450   : > { %p777_p11 = pneg %p776_p13 }
 0x452   : > { %996 = dma.done.wait (%p777_p11), %s645_s9, 128  }
 0x453   : > { %998 = vsyncadd (%p777_p11), %s645_s9, 4294967168  ;;  %p19_p0 = scmp.ge.s32.totalorder %s1106_s12, 4   ;;  %s1269_s18 = smov %s1005_s19 }
 0x454   : > { %s1270_s19 = smov %s1009_s20  ;;  %s1271_s20 = smov %s1117_s15 }
 0x455   : > { %s1272_s21 = smov %s1106_s12  ;;  %21 = sbr.rel (!%p19_p0) target bundleno = 6 (0x6), region = 93 }
 0x45a   :  { %651 = vsyncpa [#allocation3], 1 }
 0x45b   :  { %653 = vsyncpa [#allocation3 + $0x1], 1 }
 0x45c   :  { %654 = vsyncpa [#allocation6], 1 }
 0x45d   :  { %655 = vsyncpa [#allocation4], 1 }
 0x45e   :  { %657 = vsyncpa [#allocation4 + $0x1], 1 }

</bundles_post_ra>
